<compile_context>
chip_gen: v6e
topology: v6e:2x2x1
jax: 0.10.0
libtpu: 0.0.40
codegen_flags: <defaults>
</compile_context>

<pallas_src>
from typing import List

import jax
import jax.numpy as jnp
from jax import lax
from jax.experimental import pallas as pl
from jax.experimental.pallas import tpu as pltpu

_LANE = 128


def _round_up(x: int, m: int) -> int:
    return (x + m - 1) // m * m


def _vmem_capacity_bytes() -> int:
    """Generation-aware physical VMEM size (v5e/v6e: 128 MiB, v7x: 64 MiB)."""
    try:
        return int(pltpu.get_tpu_info().vmem_capacity_bytes)
    except Exception:
        return 64 * 1024 * 1024  # conservative fallback (v7x-sized)


def _readout_kernel(x_ref, w_ref, b_ref, o_ref):
    # x_ref: (TM, D) f32  -> cast to bf16 in-kernel (saves a full XLA pass
    #                        over x in HBM; the cast hides under DMA/MXU).
    # w_ref: (D, TN) bf16, b_ref: (1, TN) f32, o_ref: (TM, TN) f32.
    xb = x_ref[...].astype(jnp.bfloat16)
    o_ref[...] = (
        jnp.dot(xb, w_ref[...], preferred_element_type=jnp.float32) + b_ref[...]
    )


def pack_params(weights: List[jax.Array], biases: List[jax.Array]):
    """Pack per-head Linear params once (hoisted out of the forward path)."""
    d = weights[0].shape[0]
    c_sizes = tuple(int(w.shape[1]) for w in weights)
    c_total = sum(c_sizes)
    c_pad = _round_up(c_total, _LANE)

    w_all = jnp.concatenate(weights, axis=1)                   # (D, C_total) f32
    b_all = jnp.concatenate(biases, axis=0)[None, :]           # (1, C_total) f32
    if c_pad != c_total:
        w_all = jnp.pad(w_all, ((0, 0), (0, c_pad - c_total)))
        b_all = jnp.pad(b_all, ((0, 0), (0, c_pad - c_total)))

    # Weight streamed as bf16 (memory-bound kernel); bias stays f32.
    w_all = w_all.astype(jnp.bfloat16)
    return w_all, b_all, c_sizes, d, c_pad


def _choose_tiles(m: int, d: int, c_pad: int, budget: int):
    """Pick (tm, tn) so the double-buffered working set fits `budget` bytes."""
    # Prefer tn == c_pad (no C tiling): the packed weight is then DMA'd once
    # per M tile and never re-streamed. Shrink only if the double-buffered W
    # slab alone would eat more than half the budget (very large D regime).
    tn = c_pad
    while tn > _LANE and 2 * d * tn * 2 > budget // 2:
        tn = _round_up(tn // 2, _LANE)

    def step_bytes(tm):
        # x(f32) + W(bf16) + bias(f32) + out(f32), each double-buffered.
        return 2 * (tm * d * 4 + d * tn * 2 + tn * 4 + tm * tn * 4)

    align = 16 if m >= 16 else 8
    m_al = _round_up(m, align)
    tm = min(2048, m_al)
    while tm > align and step_bytes(tm) > budget:
        tm = max(align, _round_up(tm // 2, align))
    # Keep >= 2 M-tiles when m is large so both v7x TensorCores get work
    # (only the M axis is "parallel"); no-op on single-TC v5e/v6e.
    if m_al >= 2 * _LANE:
        tm = min(tm, _round_up(pl.cdiv(m_al, 2), _LANE))
    tm = max(align, min(_round_up(tm, align), m_al))
    return tm, tn


def make_forward(packed):
    """Build a jitted forward for a fixed packed parameter set."""
    w_all, b_all, c_sizes, d, c_pad = packed
    cap = _vmem_capacity_bytes()
    budget = int(cap * 0.70)                         # tile working-set budget
    vmem_limit = min(int(cap * 0.85), 112 * 1024 * 1024)

    @jax.jit
    def forward(x: jax.Array):
        bs, ns, _ = x.shape
        m = bs * ns
        x_flat = x.reshape(m, d)                     # f32; NO wrapper-side cast

        tm, tn = _choose_tiles(m, d, c_pad, budget)
        grid = (pl.cdiv(m, tm), pl.cdiv(c_pad, tn))  # C axis innermost/fastest

        cost = pl.CostEstimate(
            flops=2 * m * d * c_pad,
            transcendentals=0,
            bytes_accessed=m * d * 4 + d * c_pad * 2 + c_pad * 4 + m * c_pad * 4,
        )

        out = pl.pallas_call(
            _readout_kernel,
            out_shape=jax.ShapeDtypeStruct((m, c_pad), jnp.float32),
            grid_spec=pltpu.PrefetchScalarGridSpec(
                num_scalar_prefetch=0,
                grid=grid,
                in_specs=[
                    # x indexed only by the M-tile axis -> stays resident
                    # across consecutive C tiles (no redundant HBM reads).
                    pl.BlockSpec((tm, d), lambda mi, ci: (mi, 0)),
                    pl.BlockSpec((d, tn), lambda mi, ci: (0, ci)),
                    pl.BlockSpec((1, tn), lambda mi, ci: (0, ci)),
                ],
                out_specs=pl.BlockSpec((tm, tn), lambda mi, ci: (mi, ci)),
            ),
            compiler_params=pltpu.CompilerParams(
                # Megacore (v7x) shards only the M axis; C is "arbitrary" so
                # the two cores never duplicate x reads.
                dimension_semantics=("parallel", "arbitrary"),
                vmem_limit_bytes=vmem_limit,
            ),
            cost_estimate=cost,
        )(x_flat, w_all, b_all)

        # Module contract: a list of per-variable logits reshaped to
        # (bs, ns, nc). This slice materialization is a semantics cost; fuse
        # the consumer on the packed (m, c_pad) slab to avoid it if possible.
        outs = []
        off = 0
        for nc in c_sizes:
            outs.append(out[:, off:off + nc].reshape(bs, ns, nc))
            off += nc
        return outs

    return forward


def init_params(key, d: int, gt_num_categories: List[int]):
    """Deterministic Linear(D, nc) parameters per categorical variable."""
    weights, biases = [], []
    for i, nc in enumerate(gt_num_categories):
        kw, kb = jax.random.split(jax.random.fold_in(key, i))
        # mimic nn.Linear default init scale (uniform +- 1/sqrt(D))
        bound = 1.0 / jnp.sqrt(d)
        weights.append(jax.random.uniform(kw, (d, nc), jnp.float32, -bound, bound))
        biases.append(jax.random.uniform(kb, (nc,), jnp.float32, -bound, bound))
    return weights, biases


if __name__ == "__main__":
    key = jax.random.PRNGKey(0)
    bs, ns, d = 2, 4, 32
    gt_num_categories = [3, 5, 7]

    kx, kp = jax.random.split(key)
    x = jax.random.normal(kx, (bs, ns, d), jnp.float32)
    weights, biases = init_params(kp, d, gt_num_categories)

    packed = pack_params(weights, biases)          # pack once, outside forward
    forward = make_forward(packed)

    outs = forward(x)
    outs = [jax.block_until_ready(o) for o in outs]

    # Reference uses the same bf16 input/weight casts (f32 accumulation), so
    # the comparison is tight at D=32; loosen tolerance for large D (bf16
    # quantization error grows with D).
    x_flat = x.reshape(bs * ns, d)
    xb = x_flat.astype(jnp.bfloat16).astype(jnp.float32)
    for o, w, b in zip(outs, weights, biases):
        wb = w.astype(jnp.bfloat16).astype(jnp.float32)
        ref = (
            jnp.dot(xb, wb, precision=lax.Precision.HIGHEST) + b
        ).reshape(bs, ns, -1)
        assert o.shape == (bs, ns, w.shape[1])
        assert jnp.allclose(o, ref, atol=1e-3, rtol=1e-3), "mismatch vs reference"

    print("KERNEL_OK")
</pallas_src>

<mosaic_0001>
module attributes {stable_mosaic.version = 11 : i64} {
  func.func @_readout_kernel(%arg0: i32, %arg1: i32, %arg2: memref<8x32xf32, #tpu.memory_space<vmem>>, %arg3: memref<32x128xbf16, #tpu.memory_space<vmem>>, %arg4: memref<1x128xf32, #tpu.memory_space<vmem>>, %arg5: memref<8x128xf32, #tpu.memory_space<vmem>>) attributes {dimension_semantics = [#tpu.dimension_semantics<parallel>, #tpu.dimension_semantics<arbitrary>], iteration_bounds = array<i64: 1, 1>, scalar_prefetch = 0 : i64, scratch_operands = 0 : i64, tpu.core_type = #tpu.core_type<tc>, window_params = [{transform_indices = @transform_0, window_bounds = array<i64: 8, 32>}, {transform_indices = @transform_1, window_bounds = array<i64: 32, 128>}, {transform_indices = @transform_2, window_bounds = array<i64: 1, 128>}, {transform_indices = @transform_3, window_bounds = array<i64: 8, 128>}]} {
    %c0 = arith.constant 0 : index
    %c0_0 = arith.constant 0 : index
    %0 = vector.load %arg2[%c0, %c0_0] : memref<8x32xf32, #tpu.memory_space<vmem>>, vector<8x32xf32>
    %1 = arith.truncf %0 : vector<8x32xf32> to vector<8x32xbf16>
    %c0_1 = arith.constant 0 : index
    %c0_2 = arith.constant 0 : index
    %2 = vector.load %arg3[%c0_1, %c0_2] : memref<32x128xbf16, #tpu.memory_space<vmem>>, vector<32x128xbf16>
    %cst = arith.constant dense<0.000000e+00> : vector<8x128xf32>
    %3 = tpu.matmul %1, %2, %cst {dimension_numbers = #tpu.dot_dimension_numbers<[1], [0], [0], [1], [0, 0, 1, 1], [], []>} : vector<8x32xbf16>, vector<32x128xbf16>, vector<8x128xf32> -> vector<8x128xf32>
    %c0_3 = arith.constant 0 : index
    %c0_4 = arith.constant 0 : index
    %4 = vector.load %arg4[%c0_3, %c0_4] : memref<1x128xf32, #tpu.memory_space<vmem>>, vector<1x128xf32>
    %5 = vector.broadcast %4 : vector<1x128xf32> to vector<8x128xf32>
    %6 = arith.addf %3, %5 : vector<8x128xf32>
    %c0_5 = arith.constant 0 : index
    %c0_6 = arith.constant 0 : index
    %7 = vector.load %arg5[%c0_5, %c0_6] : memref<8x128xf32, #tpu.memory_space<vmem>>, vector<8x128xf32>
    tpu.vector_store %arg5[%c0_5, %c0_6], %6 {strides = array<i32>} : memref<8x128xf32, #tpu.memory_space<vmem>>, vector<8x128xf32>,
    return
  }
  func.func @transform_0(%arg0: i32, %arg1: i32) -> (i32, i32) {
    %c0_i32 = arith.constant 0 : i32
    %c0_i32_0 = arith.constant 0 : i32
    return %arg0, %c0_i32 : i32, i32
  }
  func.func @transform_1(%arg0: i32, %arg1: i32) -> (i32, i32) {
    %c0_i32 = arith.constant 0 : i32
    %c0_i32_0 = arith.constant 0 : i32
    return %c0_i32, %arg1 : i32, i32
  }
  func.func @transform_2(%arg0: i32, %arg1: i32) -> (i32, i32) {
    %c0_i32 = arith.constant 0 : i32
    %c0_i32_0 = arith.constant 0 : i32
    return %c0_i32, %arg1 : i32, i32
  }
  func.func @transform_3(%arg0: i32, %arg1: i32) -> (i32, i32) {
    %c0_i32 = arith.constant 0 : i32
    return %arg0, %arg1 : i32, i32
  }
}

</mosaic_0001>

<bundles_post_ra>
// kernel: forward.1
= control target key start
LH: loop header
LB: loop body
LE: loop exit
PB: predicated region body
PF: predicated region fallthrough
CT: control target
= control target key end

     0   :  { %8 = vsyncpa [#allocation3], 0  ;;  %s222_s0 = inlined_call_operand.hbm [shape: f32[8,32], index: 0, kind: input, shape index: {}]   ;;  %s223_s1 = inlined_call_operand.hbm [shape: bf16[32,128], index: 1, kind: input, shape index: {}]   ;;  %s224_s2 = inlined_call_operand.vmem [shape: f32[1,128], index: 2, kind: input, shape index: {}]   ;;  %s225_s3 = inlined_call_operand.vmem [shape: f32[8,128], index: 3, kind: output, shape index: {}]  }
   0x1   :  { %9 = vsyncpa [#allocation5], 0  ;;  %s184_s12 = smov [#allocation2]   ;;  %s185_s14 = smov [#allocation4]  }
   0x2   :  { %s16_s13 = sshll.u32 %s184_s12, 4  ;;  %s25_s15 = sshll.u32 %s185_s14, 4  ;;  %s17_s13 = int_to_ptr.vmem [resolvable:$true] %s16_s13  ;;  %s26_s15 = int_to_ptr.vmem [resolvable:$true] %s25_s15 }
   0x3   :  { %s148_s16 = scalar_lea.vmem %s17_s13, 128  ;;  %p153_p1 = scmp.lt.s32.totalorder %s17_s13, %s17_s13 }
   0x4   :  { %p149_p0 = scmp.ne.s32.totalorder %s17_s13, %s148_s16  ;;  %p154_p2 = scmp.lt.s32.totalorder %s148_s16, %s148_s16 }
   0x6   :  { %p155_p3 = por %p154_p2, %p153_p1 }
   0x8   :  { %p156_p4 = pnand %p155_p3, %p149_p0 }
   0xa   :  { %159 = shalt.err (!%p156_p4)
}
   0xb   :  { %19 = dma.hbm_to_vmem [thread:$0]  %s222_s0, 128, %s17_s13, [#allocation3]  }
   0xc   :  { %s168_s19 = scalar_lea.vmem %s26_s15, 256  ;;  %p173_p6 = scmp.lt.s32.totalorder %s26_s15, %s26_s15 }
   0xd   :  { %p169_p5 = scmp.ne.s32.totalorder %s26_s15, %s168_s19  ;;  %p174_p7 = scmp.lt.s32.totalorder %s168_s19, %s168_s19 }
   0xf   :  { %p175_p8 = por %p174_p7, %p173_p6 }
  0x11   :  { %p176_p9 = pnand %p175_p8, %p169_p5 }
  0x13   :  { %179 = shalt.err (!%p176_p9)
}
  0x14   :  { %s186_s20 = smov 64   ;;  %s187_s21 = smov 4  }
  0x15   :  { %31 = dma.hbm_to_vmem [thread:$0]  %s223_s1, 256, %s26_s15, [#allocation5], %s186_s20, %s186_s20, %s187_s21  }
  0x16   :  { %180 = dma.done.wait [#allocation3], 128  }
  0x17   :  { %181 = vsyncadd [#allocation3], 4294967168 }
  0x18   :  { %182 = dma.done.wait [#allocation5], 256  }
  0x19   :  { %183 = vsyncadd [#allocation5], 4294967040  ;;  %v188_v0 = vmov 0.0   ;;  %vm189_vm0 = vmmov 0   ;;  %v138_v1 = vld [vmem:[#allocation4 + $0x8] sm:$0xff]   ;;  %v139_v2 = vld [vmem:[#allocation4] sm:$0xff]  }
  0x1a   :  { %124 = vmatprep.subr.bf16.mxu0 %v188_v0  ;;  %128 = vmatprep.mubr.msk.bf16.mxu0 %vm189_vm0, %v188_v0  ;;  %v41_v3 = vld [vmem:[#allocation2] sm:$0xff]  ;;  %vm66_vm1 = vcmask 261120  }
  0x1b   :  { %125 = vmatpush3.bf16.msra.mxu0 %v138_v1  ;;  %v42_v4 = vpack.c.bf16 %v41_v3, %v41_v3  ;;  %v117_v5 = vld [vmem:[%s224_s2] ss:$0 sm:$0xff] }
  0x1c   :  { %126 = vmatprep.subr.bf16.mxu0 %v188_v0 }
  0x1f   :  { %127 = vmatpush3.bf16.msra.mxu0 %v139_v2 }
  0x22   :  { %129 = vmatmul.mubr.msk.bf16.vlgmr.msra.gmra.mxu0 %vm66_vm1, %v42_v4 }
  0xe2   :  { %v104_v6 = vpop.f32.mrf.mxu0 }
  0xe3   :  { %v105_v7 = vadd.f32 %v117_v5, %v104_v6 }
  0xe4   :  { %v130_v8 = vpop.f32.mrf.mxu0 }
  0xe5   :  { %110 = vst [vmem:[%s225_s3] sm:$0xff] %v105_v7 }
  0xe6   :  { %v107_v9 = vpop.f32.mrf.mxu0 }
  0xe8   :  { %v131_v10 = vpop.f32.mrf.mxu0 }
  0xe9   :  { %115 = vsyncpa [#allocation3], 1 }
  0xea   :  { %116 = vsyncpa [#allocation5], 1 }

</bundles_post_ra>
